<compile_context>
chip_gen: v7x
topology: tpu7x:2x2x1
jax: 0.10.0
libtpu: 0.0.40
codegen_flags: <defaults>
</compile_context>

<pallas_src>
import functools

import jax
import jax.numpy as jnp
from jax.experimental import pallas as pl
from jax.experimental.pallas import tpu as pltpu


def _round_up(x, m):
    return (x + m - 1) // m * m


def _cdiv(a, b):
    return (a + b - 1) // b


def _device_config():
    """Per-generation tiling policy."""
    kind = ""
    try:
        kind = jax.devices()[0].device_kind.lower()
    except Exception:
        pass
    if "v5" in kind:
        # v5e: 128 MiB VMEM, ~0.82 TB/s HBM, no bf16 VALU, 1 TensorCore.
        return dict(row_target=512, vmem_cap=100 << 20, n_cores=1, bf16_vpu=False)
    if "v6" in kind:
        # v6e: 128 MiB VMEM, ~1.4 TB/s HBM, bf16 VALU, 1 TensorCore.
        return dict(row_target=1024, vmem_cap=100 << 20, n_cores=1, bf16_vpu=True)
    if "v7" in kind or "tpu7" in kind or "7x" in kind:
        # v7x: 64 MiB VMEM per TC, 3.2 TB/s HBM, bf16 VALU, 2 TensorCores.
        return dict(row_target=512, vmem_cap=52 << 20, n_cores=2, bf16_vpu=True)
    # Unknown chip: conservative defaults.
    return dict(row_target=512, vmem_cap=48 << 20, n_cores=1, bf16_vpu=False)


def _mlp_kernel(x_ref, w1_ref, b1_ref, w2_ref, b2_ref, o_ref, acc_ref, *,
                act_dtype):
    k = pl.program_id(1)

    @pl.when(k == 0)
    def _init():
        acc_ref[...] = jnp.zeros_like(acc_ref)

    # fc1 partial: (tm, c_in_p) @ (c_in_p, tk) on the MXU, f32 accumulation.
    h = jnp.dot(x_ref[...], w1_ref[...], preferred_element_type=jnp.float32)
    # bias + ReLU.  act_dtype is bf16 on chips with a bf16 VALU (halves the
    # largest per-step temporary); f32 otherwise (v5e / f32 compute path).
    # Exact under hidden tiling: padded lanes give relu(0 + 0) = 0 and hit
    # zero-padded W2 rows.
    h = h.astype(act_dtype)
    h = jnp.maximum(h + b1_ref[...].astype(act_dtype), 0.0)
    # dropout(p=0.0) ≡ identity.
    # fc2 partial: (tm, tk) @ (tk, c_out_p), accumulated in f32.
    acc_ref[...] += jnp.dot(h.astype(w2_ref.dtype), w2_ref[...],
                            preferred_element_type=jnp.float32)

    @pl.when(k == pl.num_programs(1) - 1)
    def _finalize():
        # dropout(p=0.0) ≡ identity.
        o_ref[...] = (acc_ref[...] + b2_ref[...]).astype(o_ref.dtype)


@functools.partial(
    jax.jit,
    static_argnames=("tm", "tk", "c_out", "act_dtype", "vmem_limit"))
def _mlp_call(x2d, w1p, b1p, w2p, b2p, *, tm, tk, c_out, act_dtype,
              vmem_limit):
    m, c_in = x2d.shape
    c_in_p, hidden_p = w1p.shape
    c_out_p = w2p.shape[1]
    nk = hidden_p // tk
    out_dtype = x2d.dtype
    compute_dtype = w1p.dtype

    m_pad = _round_up(m, tm)
    xp = x2d.astype(compute_dtype)
    if (m_pad != m) or (c_in_p != c_in):
        xp = jnp.pad(xp, ((0, m_pad - m), (0, c_in_p - c_in)))

    cost = pl.CostEstimate(
        flops=2 * m_pad * (c_in_p * hidden_p + hidden_p * c_out_p),
        transcendentals=0,
        bytes_accessed=(xp.size * xp.dtype.itemsize
                        + w1p.size * w1p.dtype.itemsize
                        + w2p.size * w2p.dtype.itemsize
                        + (b1p.size + b2p.size) * 4
                        + m_pad * c_out_p * jnp.dtype(out_dtype).itemsize),
    )

    kernel = functools.partial(_mlp_kernel, act_dtype=act_dtype)

    out2d = pl.pallas_call(
        kernel,
        out_shape=jax.ShapeDtypeStruct((m_pad, c_out_p), out_dtype),
        grid_spec=pltpu.PrefetchScalarGridSpec(
            num_scalar_prefetch=0,
            grid=(m_pad // tm, nk),
            in_specs=[
                pl.BlockSpec((tm, c_in_p), lambda i, k: (i, 0)),     # x tile
                pl.BlockSpec((c_in_p, tk), lambda i, k: (0, k)),     # W1 cols
                pl.BlockSpec((1, tk), lambda i, k: (0, k)),          # b1 slice
                pl.BlockSpec((tk, c_out_p), lambda i, k: (k, 0)),    # W2 rows
                pl.BlockSpec((1, c_out_p), lambda i, k: (0, 0)),     # b2
            ],
            out_specs=pl.BlockSpec((tm, c_out_p), lambda i, k: (i, 0)),
            scratch_shapes=[pltpu.VMEM((tm, c_out_p), jnp.float32)],
        ),
        compiler_params=pltpu.CompilerParams(
            dimension_semantics=("parallel", "arbitrary"),
            vmem_limit_bytes=vmem_limit,
        ),
        cost_estimate=cost,
    )(xp, w1p, b1p, w2p, b2p)

    # No-ops when no padding was applied.
    return out2d[:m, :c_out]


class MlpPallas:
    """fc1 -> ReLU -> dropout(0) -> fc2 -> dropout(0), fused on TPU.

    Weights are stored transposed vs. PyTorch ((in, hidden), (hidden, out)),
    cast to the compute dtype and zero-padded to lane-dense (x128) shapes
    ONCE at construction, so the per-forward cost is just the fused kernel
    (no per-call weight pass over HBM).
    """

    def __init__(self, w1, b1, w2, b2, compute_dtype=jnp.bfloat16):
        c_in, hidden = w1.shape
        hidden2, c_out = w2.shape
        assert hidden2 == hidden and b1.shape == (hidden,) and b2.shape == (c_out,)
        self.c_in, self.hidden, self.c_out = c_in, hidden, c_out
        self.compute_dtype = jnp.dtype(compute_dtype)

        cfg = _device_config()
        self.n_cores = cfg["n_cores"]
        vmem_cap = cfg["vmem_cap"]
        budget = int(vmem_cap * 0.75)

        self.c_in_p = _round_up(c_in, 128)
        self.c_out_p = _round_up(c_out, 128)
        cbytes = self.compute_dtype.itemsize

        # bias+ReLU dtype: bf16 only where the VPU supports it and we are on
        # the bf16 compute path; otherwise f32 (keeps the f32 path exact).
        self.act_dtype = (self.compute_dtype
                          if (cfg["bf16_vpu"]
                              and self.compute_dtype == jnp.dtype(jnp.bfloat16))
                          else jnp.dtype(jnp.float32))

        # Hidden-dim tiling: fewest k-steps whose worst-case (row_target-sized)
        # working set fits the VMEM budget.  nk == 1 -> weight block indices
        # are grid-constant -> W1/W2 are fetched from HBM exactly once.
        row_target = cfg["row_target"]
        while True:
            nk = 0
            while True:
                nk += 1
                tk = _round_up(_cdiv(hidden, nk), 128)
                need = self._vmem_need(row_target, tk, cbytes)
                if need <= budget or tk <= 128:
                    break
            if need <= budget or row_target <= 64:
                break
            row_target //= 2
        self.row_target = row_target
        self.tk = tk
        self.hidden_p = nk * tk
        self.vmem_limit = max(32 << 20,
                              min(int(need * 1.25) + (4 << 20), vmem_cap))
        self.vmem_limit = min(self.vmem_limit, vmem_cap)

        # One-time weight cast + lane-dense zero padding (hoisted out of the
        # per-call path).  Padded bias entries MUST stay zero for the hidden
        # split to be exact.
        self.w1p = jnp.pad(
            jnp.asarray(w1, self.compute_dtype),
            ((0, self.c_in_p - c_in), (0, self.hidden_p - hidden)))
        self.w2p = jnp.pad(
            jnp.asarray(w2, self.compute_dtype),
            ((0, self.hidden_p - hidden), (0, self.c_out_p - c_out)))
        self.b1p = jnp.pad(jnp.asarray(b1, jnp.float32),
                           (0, self.hidden_p - hidden)).reshape(1, self.hidden_p)
        self.b2p = jnp.pad(jnp.asarray(b2, jnp.float32),
                           (0, self.c_out_p - c_out)).reshape(1, self.c_out_p)

    def _vmem_need(self, tm, tk, cbytes):
        abytes = jnp.dtype(self.act_dtype).itemsize
        return (2 * tm * self.c_in_p * cbytes     # x tile (double-buffered)
                + 2 * self.c_in_p * tk * cbytes   # W1 tile
                + 2 * tk * self.c_out_p * cbytes  # W2 tile
                + 2 * (tk + self.c_out_p) * 4     # biases (f32)
                + 2 * tm * self.c_out_p * 4       # out tile (<= f32)
                + tm * self.c_out_p * 4           # f32 accumulator scratch
                + tm * tk * max(abytes, 4))       # fc1 intermediate (f32 pop)

    def _row_tile(self, m):
        tm = min(self.row_target, _round_up(m, 8))
        # v7x: the parallel row axis needs >= n_cores tiles, or a TensorCore
        # sits idle (no-op on 1-TC chips).
        while self.n_cores > 1 and _cdiv(m, tm) < self.n_cores and tm > 8:
            tm = _round_up(_cdiv(tm, 2), 8)
        return tm

    def __call__(self, x):
        orig_shape = x.shape
        assert orig_shape[-1] == self.c_in
        x2d = x.reshape(-1, self.c_in)
        tm = self._row_tile(x2d.shape[0])
        out2d = _mlp_call(x2d, self.w1p, self.b1p, self.w2p, self.b2p,
                          tm=tm, tk=self.tk, c_out=self.c_out,
                          act_dtype=self.act_dtype,
                          vmem_limit=self.vmem_limit)
        return out2d.reshape(*orig_shape[:-1], self.c_out)


def init_mlp_params(key, in_features, hidden_features, out_features,
                    dtype=jnp.float32):
    """Deterministic synthetic init (PyTorch-like uniform fan-in bounds)."""
    k1, k2, k3, k4 = jax.random.split(key, 4)
    bound1 = 1.0 / (in_features ** 0.5)
    bound2 = 1.0 / (hidden_features ** 0.5)
    # stored transposed vs. PyTorch: (in, hidden) and (hidden, out)
    w1 = jax.random.uniform(k1, (in_features, hidden_features),
                            dtype, -bound1, bound1)
    b1 = jax.random.uniform(k2, (hidden_features,), dtype, -bound1, bound1)
    w2 = jax.random.uniform(k3, (hidden_features, out_features),
                            dtype, -bound2, bound2)
    b2 = jax.random.uniform(k4, (out_features,), dtype, -bound2, bound2)
    return w1, b1, w2, b2


def mlp_reference(x, w1, b1, w2, b2):
    h = jnp.maximum(x @ w1 + b1, 0.0)
    return h @ w2 + b2


if __name__ == "__main__":
    key = jax.random.PRNGKey(0)
    kx, kp = jax.random.split(key)

    B, N = 2, 8          # batch, tokens
    in_features = 32
    hidden_features = 64
    out_features = 32    # out_features defaults to in_features in the module

    x = jax.random.normal(kx, (B, N, in_features), jnp.float32)
    w1, b1, w2, b2 = init_mlp_params(kp, in_features, hidden_features,
                                     out_features)
    ref = mlp_reference(x, w1, b1, w2, b2)

    # f32 compute path: exact check
    mlp_f32 = MlpPallas(w1, b1, w2, b2, compute_dtype=jnp.float32)
    out_f32 = jax.block_until_ready(mlp_f32(x))
    assert out_f32.shape == (B, N, out_features)
    assert jnp.allclose(out_f32, ref, atol=1e-5, rtol=1e-5), "f32 mismatch"

    # default bf16 compute path (MXU-native): relaxed tolerance
    mlp_bf16 = MlpPallas(w1, b1, w2, b2)
    out_bf16 = jax.block_until_ready(mlp_bf16(x))
    assert out_bf16.shape == (B, N, out_features)
    assert jnp.allclose(out_bf16, ref, atol=3e-2, rtol=3e-2), "bf16 mismatch"

    print("KERNEL_OK")
</pallas_src>

<mosaic_0001>
module attributes {stable_mosaic.version = 11 : i64} {
  func.func @_mlp_kernel(%arg0: i32, %arg1: i32, %arg2: memref<16x128xf32, #tpu.memory_space<vmem>>, %arg3: memref<128x128xf32, #tpu.memory_space<vmem>>, %arg4: memref<1x128xf32, #tpu.memory_space<vmem>>, %arg5: memref<128x128xf32, #tpu.memory_space<vmem>>, %arg6: memref<1x128xf32, #tpu.memory_space<vmem>>, %arg7: memref<16x128xf32, #tpu.memory_space<vmem>>, %arg8: memref<16x128xf32, #tpu.memory_space<vmem>>) attributes {dimension_semantics = [#tpu.dimension_semantics<parallel>, #tpu.dimension_semantics<arbitrary>], iteration_bounds = array<i64: 1, 1>, scalar_prefetch = 0 : i64, scratch_operands = 1 : i64, tpu.core_type = #tpu.core_type<tc>, window_params = [{transform_indices = @transform_0, window_bounds = array<i64: 16, 128>}, {transform_indices = @transform_1, window_bounds = array<i64: 128, 128>}, {transform_indices = @transform_2, window_bounds = array<i64: 1, 128>}, {transform_indices = @transform_3, window_bounds = array<i64: 128, 128>}, {pipeline_mode = #tpu.pipeline_mode<synchronous>, transform_indices = @transform_4, window_bounds = array<i64: 1, 128>}, {transform_indices = @transform_5, window_bounds = array<i64: 16, 128>}]} {
    %c0_i32 = arith.constant 0 : i32
    %0 = arith.cmpi eq, %arg1, %c0_i32 : i32
    %1 = arith.extui %0 : i1 to i32
    %c0_i32_0 = arith.constant 0 : i32
    %2 = arith.cmpi ne, %1, %c0_i32_0 : i32
    scf.if %2 {
      %cst_16 = arith.constant 0.000000e+00 : f32
      %19 = vector.broadcast %cst_16 : f32 to vector<16x128xf32>
      %c0_17 = arith.constant 0 : index
      %c0_18 = arith.constant 0 : index
      %20 = vector.load %arg8[%c0_17, %c0_18] : memref<16x128xf32, #tpu.memory_space<vmem>>, vector<16x128xf32>
      tpu.vector_store %arg8[%c0_17, %c0_18], %19 {strides = array<i32>} : memref<16x128xf32, #tpu.memory_space<vmem>>, vector<16x128xf32>,
    } else {
    }
    %c0 = arith.constant 0 : index
    %c0_1 = arith.constant 0 : index
    %3 = vector.load %arg2[%c0, %c0_1] : memref<16x128xf32, #tpu.memory_space<vmem>>, vector<16x128xf32>
    %c0_2 = arith.constant 0 : index
    %c0_3 = arith.constant 0 : index
    %4 = vector.load %arg3[%c0_2, %c0_3] : memref<128x128xf32, #tpu.memory_space<vmem>>, vector<128x128xf32>
    %cst = arith.constant dense<0.000000e+00> : vector<16x128xf32>
    %5 = tpu.matmul %3, %4, %cst {dimension_numbers = #tpu.dot_dimension_numbers<[1], [0], [0], [1], [0, 0, 1, 1], [], []>} : vector<16x128xf32>, vector<128x128xf32>, vector<16x128xf32> -> vector<16x128xf32>
    %c0_4 = arith.constant 0 : index
    %c0_5 = arith.constant 0 : index
    %6 = vector.load %arg4[%c0_4, %c0_5] : memref<1x128xf32, #tpu.memory_space<vmem>>, vector<1x128xf32>
    %7 = vector.broadcast %6 : vector<1x128xf32> to vector<16x128xf32>
    %8 = arith.addf %5, %7 : vector<16x128xf32>
    %cst_6 = arith.constant 0.000000e+00 : f32
    %9 = vector.broadcast %cst_6 : f32 to vector<16x128xf32>
    %10 = arith.maximumf %8, %9 : vector<16x128xf32>
    %c0_7 = arith.constant 0 : index
    %c0_8 = arith.constant 0 : index
    %11 = vector.load %arg8[%c0_7, %c0_8] : memref<16x128xf32, #tpu.memory_space<vmem>>, vector<16x128xf32>
    %c0_9 = arith.constant 0 : index
    %c0_10 = arith.constant 0 : index
    %12 = vector.load %arg5[%c0_9, %c0_10] : memref<128x128xf32, #tpu.memory_space<vmem>>, vector<128x128xf32>
    %cst_11 = arith.constant dense<0.000000e+00> : vector<16x128xf32>
    %13 = tpu.matmul %10, %12, %cst_11 {dimension_numbers = #tpu.dot_dimension_numbers<[1], [0], [0], [1], [0, 0, 1, 1], [], []>} : vector<16x128xf32>, vector<128x128xf32>, vector<16x128xf32> -> vector<16x128xf32>
    %14 = arith.addf %11, %13 : vector<16x128xf32>
    %c0_12 = arith.constant 0 : index
    %c0_13 = arith.constant 0 : index
    %15 = vector.load %arg8[%c0_12, %c0_13] : memref<16x128xf32, #tpu.memory_space<vmem>>, vector<16x128xf32>
    tpu.vector_store %arg8[%c0_12, %c0_13], %14 {strides = array<i32>} : memref<16x128xf32, #tpu.memory_space<vmem>>, vector<16x128xf32>,
    %c0_i32_14 = arith.constant 0 : i32
    %16 = arith.cmpi eq, %arg1, %c0_i32_14 : i32
    %17 = arith.extui %16 : i1 to i32
    %c0_i32_15 = arith.constant 0 : i32
    %18 = arith.cmpi ne, %17, %c0_i32_15 : i32
    scf.if %18 {
      %c0_16 = arith.constant 0 : index
      %c0_17 = arith.constant 0 : index
      %19 = vector.load %arg8[%c0_16, %c0_17] : memref<16x128xf32, #tpu.memory_space<vmem>>, vector<16x128xf32>
      %c0_18 = arith.constant 0 : index
      %c0_19 = arith.constant 0 : index
      %20 = vector.load %arg6[%c0_18, %c0_19] : memref<1x128xf32, #tpu.memory_space<vmem>>, vector<1x128xf32>
      %21 = vector.broadcast %20 : vector<1x128xf32> to vector<16x128xf32>
      %22 = arith.addf %19, %21 : vector<16x128xf32>
      %c0_20 = arith.constant 0 : index
      %c0_21 = arith.constant 0 : index
      %23 = vector.load %arg7[%c0_20, %c0_21] : memref<16x128xf32, #tpu.memory_space<vmem>>, vector<16x128xf32>
      tpu.vector_store %arg7[%c0_20, %c0_21], %22 {strides = array<i32>} : memref<16x128xf32, #tpu.memory_space<vmem>>, vector<16x128xf32>,
    } else {
    }
    return
  }
  func.func @transform_0(%arg0: i32, %arg1: i32) -> (i32, i32) {
    %c0_i32 = arith.constant 0 : i32
    %c0_i32_0 = arith.constant 0 : i32
    return %arg0, %c0_i32 : i32, i32
  }
  func.func @transform_1(%arg0: i32, %arg1: i32) -> (i32, i32) {
    %c0_i32 = arith.constant 0 : i32
    %c0_i32_0 = arith.constant 0 : i32
    return %c0_i32, %arg1 : i32, i32
  }
  func.func @transform_2(%arg0: i32, %arg1: i32) -> (i32, i32) {
    %c0_i32 = arith.constant 0 : i32
    %c0_i32_0 = arith.constant 0 : i32
    return %c0_i32, %arg1 : i32, i32
  }
  func.func @transform_3(%arg0: i32, %arg1: i32) -> (i32, i32) {
    %c0_i32 = arith.constant 0 : i32
    %c0_i32_0 = arith.constant 0 : i32
    return %arg1, %c0_i32 : i32, i32
  }
  func.func @transform_4(%arg0: i32, %arg1: i32) -> (i32, i32) {
    %c0_i32 = arith.constant 0 : i32
    %c0_i32_0 = arith.constant 0 : i32
    %c0_i32_1 = arith.constant 0 : i32
    return %c0_i32, %c0_i32_0 : i32, i32
  }
  func.func @transform_5(%arg0: i32, %arg1: i32) -> (i32, i32) {
    %c0_i32 = arith.constant 0 : i32
    %c0_i32_0 = arith.constant 0 : i32
    return %arg0, %c0_i32 : i32, i32
  }
}

</mosaic_0001>

<bundles_post_ra>
// kernel: _mlp_call.1
= control target key start
LH: loop header
LB: loop body
LE: loop exit
PB: predicated region body
PF: predicated region fallthrough
CT: control target
= control target key end

     0   :  { %10 = vsyncpa [#allocation4], 0  ;;  %s629_s0 = inlined_call_operand.vmem [shape: f32[16,128], index: 0, kind: input, shape index: {}]   ;;  %s630_s1 = inlined_call_operand.hbm [shape: f32[128,128], index: 1, kind: input, shape index: {}]   ;;  %s631_s2 = inlined_call_operand.vmem [shape: f32[1,128], index: 2, kind: input, shape index: {}]   ;;  %s632_s3 = inlined_call_operand.hbm [shape: f32[128,128], index: 3, kind: input, shape index: {}]   ;;  %s633_s4 = inlined_call_operand.vmem [shape: f32[1,128], index: 4, kind: input, shape index: {}]   ;;  %s634_s5 = inlined_call_operand.hbm [shape: f32[16,128], index: 5, kind: output, shape index: {}]  }
   0x1   :  { %11 = vsyncpa [#allocation7], 0 }
   0x2   :  { %12 = vsyncpa [#allocation5], 0  ;;  %s537_s18 = smov [#allocation3]   ;;  %s465_s22 = scalar_lea.hbm %s630_s1, 2048 }
   0x3   :  { %s20_s19 = sshll.u32 %s537_s18, 4  ;;  %p466_p0 = scmp.ne.s32.totalorder %s630_s1, %s465_s22  ;;  %s21_s19 = int_to_ptr.vmem [resolvable:$true] %s20_s19 }
   0x4   :  { %p469_p1 = scmp.lt.u32.totalorder %s465_s22, %s630_s1 }
   0x6   :  { %p471_p2 = pnand %p469_p1, %p466_p0 }
   0x8   :  { %474 = shalt.err (!%p471_p2)
}
   0x9   :  { %s475_s27 = scalar_lea.vmem %s21_s19, 2048  ;;  %p480_p4 = scmp.lt.s32.totalorder %s21_s19, %s21_s19 }
   0xa   :  { %p476_p3 = scmp.ne.s32.totalorder %s21_s19, %s475_s27  ;;  %p481_p5 = scmp.lt.s32.totalorder %s475_s27, %s475_s27 }
   0xc   :  { %p482_p6 = por %p481_p5, %p480_p4 }
   0xe   :  { %p483_p7 = pnand %p482_p6, %p476_p3 }
  0x10   :  { %486 = shalt.err (!%p483_p7)
}
  0x11   :  { %s538_s28 = smov 128   ;;  %s539_s29 = smov 8  }
  0x12   :  { %26 = dma.hbm_to_vmem [thread:$0]  %s630_s1, 2048, %s21_s19, [#allocation4], %s538_s28, %s538_s28, %s539_s29  }
  0x13   :  { %s540_s7 = smov [#allocation6]   ;;  %s487_s11 = scalar_lea.hbm %s632_s3, 2048 }
  0x14   :  { %s34_s8 = sshll.u32 %s540_s7, 4  ;;  %p488_p8 = scmp.ne.s32.totalorder %s632_s3, %s487_s11  ;;  %s35_s8 = int_to_ptr.vmem [resolvable:$true] %s34_s8 }
  0x15   :  { %p491_p9 = scmp.lt.u32.totalorder %s487_s11, %s632_s3 }
  0x17   :  { %p493_p10 = pnand %p491_p9, %p488_p8 }
  0x19   :  { %496 = shalt.err (!%p493_p10)
}
  0x1a   :  { %s497_s16 = scalar_lea.vmem %s35_s8, 2048  ;;  %p502_p12 = scmp.lt.s32.totalorder %s35_s8, %s35_s8 }
  0x1b   :  { %p498_p11 = scmp.ne.s32.totalorder %s35_s8, %s497_s16  ;;  %p503_p13 = scmp.lt.s32.totalorder %s497_s16, %s497_s16 }
  0x1d   :  { %p504_p0 = por %p503_p13, %p502_p12 }
  0x1f   :  { %p505_p1 = pnand %p504_p0, %p498_p11 }
  0x21   :  { %508 = shalt.err (!%p505_p1)
}
  0x22   :  { %40 = dma.hbm_to_vmem [thread:$0]  %s632_s3, 2048, %s35_s8, [#allocation7], %s538_s28, %s538_s28, %s539_s29  }
  0x23   :  { %531 = dma.done.wait [#allocation4], 2048  }
  0x24   :  { %532 = vsyncadd [#allocation4], 4294965248 }
  0x25   :  { %533 = dma.done.wait [#allocation7], 2048  }
  0x26   :  { %534 = vsyncadd [#allocation7], 4294965248  ;;  %v57_v0 = vld [vmem:[#allocation3] sm:$0xff]  ;;  %v58_v1 = vld [vmem:[#allocation3 + $0x8] sm:$0xff]  ;;  %s541_s24 = smov [#allocation8]  }
  0x27   :  { %v59_v2 = vld [vmem:[#allocation3 + $0x10] sm:$0xff]  ;;  %v396_v3 = vpack.c.bf16 %v58_v1, %v57_v0  ;;  %v60_v4 = vld [vmem:[#allocation3 + $0x18] sm:$0xff]  ;;  %v61_v6 = vld [vmem:[#allocation3 + $0x20] sm:$0xff]  ;;  %s275_s25 = sshll.u32 %s541_s24, 4  ;;  %s276_s25 = int_to_ptr.vmem [resolvable:$true] %s275_s25 }
  0x28   :  { %v400_v5 = vpack.c.bf16 %v60_v4, %v59_v2  ;;  %v62_v7 = vld [vmem:[#allocation3 + $0x28] sm:$0xff]  ;;  %v63_v9 = vld [vmem:[#allocation3 + $0x30] sm:$0xff]  ;;  %v64_v10 = vld [vmem:[#allocation3 + $0x38] sm:$0xff]  ;;  %p514_p3 = scmp.lt.s32.totalorder %s276_s25, %s276_s25 }
  0x29   :  { %397 = vmatprep.subr.bf16.mxu0 %v396_v3  ;;  %v404_v8 = vpack.c.bf16 %v62_v7, %v61_v6  ;;  %v55_v11 = vld [vmem:[%s629_s0] sm:$0xff]  ;;  %v159_v12 = vld [vmem:[#allocation6] sm:$0xff]  ;;  %v160_v13 = vld [vmem:[#allocation6 + $0x8] sm:$0xff]  ;;  %v408_v20 = vpack.c.bf16 %v64_v10, %v63_v9 }
  0x2a   :  { %399 = vmatpush3.bf16.msra.mxu0 %v396_v3  ;;  %358 = vmatprep.mubr.f32.mxu0 %v55_v11  ;;  %v161_v14 = vld [vmem:[#allocation6 + $0x10] sm:$0xff]  ;;  %v428_v15 = vpack.c.bf16 %v160_v13, %v159_v12  ;;  %v162_v16 = vld [vmem:[#allocation6 + $0x18] sm:$0xff]  ;;  %v163_v18 = vld [vmem:[#allocation6 + $0x20] sm:$0xff] }
  0x2b   :  { %401 = vmatprep.subr.bf16.mxu0 %v400_v5  ;;  %v432_v17 = vpack.c.bf16 %v162_v16, %v161_v14  ;;  %v164_v19 = vld [vmem:[#allocation6 + $0x28] sm:$0xff]  ;;  %v65_v21 = vld [vmem:[#allocation3 + $0x40] sm:$0xff]  ;;  %v165_v24 = vld [vmem:[#allocation6 + $0x30] sm:$0xff] }
  0x2c   :  { %429 = vmatprep.subr.bf16.mxu1 %v428_v15  ;;  %v66_v22 = vld [vmem:[#allocation3 + $0x48] sm:$0xff]  ;;  %v436_v23 = vpack.c.bf16 %v164_v19, %v163_v18  ;;  %v166_v25 = vld [vmem:[#allocation6 + $0x38] sm:$0xff]  ;;  %v67_v27 = vld [vmem:[#allocation3 + $0x50] sm:$0xff] }
  0x2d   :  { %431 = vmatpush3.bf16.msra.mxu1 %v428_v15  ;;  %v412_v26 = vpack.c.bf16 %v66_v22, %v65_v21  ;;  %v68_v28 = vld [vmem:[#allocation3 + $0x58] sm:$0xff]  ;;  %v440_v29 = vpack.c.bf16 %v166_v25, %v165_v24  ;;  %v167_v30 = vld [vmem:[#allocation6 + $0x40] sm:$0xff]  ;;  %v168_v31 = vld [vmem:[#allocation6 + $0x48] sm:$0xff] }
  0x2e   :  { %403 = vmatpush3.bf16.msra.mxu0 %v400_v5  ;;  %433 = vmatprep.subr.bf16.mxu1 %v432_v17  ;;  %v416_v32 = vpack.c.bf16 %v68_v28, %v67_v27  ;;  %v69_v33 = vld [vmem:[#allocation3 + $0x60] sm:$0xff]  ;;  %v70_v34 = vld [vmem:[#allocation3 + $0x68] sm:$0xff]  ;;  %v444_v35 = vpack.c.bf16 %v168_v31, %v167_v30  ;;  %v169_v36 = vld [vmem:[#allocation6 + $0x50] sm:$0xff] }
  0x2f   :  { %405 = vmatprep.subr.bf16.mxu0 %v404_v8  ;;  %v170_v37 = vld [vmem:[#allocation6 + $0x58] sm:$0xff]  ;;  %v420_v38 = vpack.c.bf16 %v70_v34, %v69_v33  ;;  %v71_v39 = vld [vmem:[#allocation3 + $0x70] sm:$0xff]  ;;  %v171_v42 = vld [vmem:[#allocation6 + $0x60] sm:$0xff] }
  0x30   :  { %v72_v40 = vld [vmem:[#allocation3 + $0x78] sm:$0xff]  ;;  %v448_v41 = vpack.c.bf16 %v170_v37, %v169_v36  ;;  %v172_v43 = vld [vmem:[#allocation6 + $0x68] sm:$0xff]  ;;  %v173_v47 = vld [vmem:[#allocation6 + $0x70] sm:$0xff] }
  0x31   :  { %435 = vmatpush3.bf16.msra.mxu1 %v432_v17  ;;  %v424_v44 = vpack.c.bf16 %v72_v40, %v71_v39  ;;  %v452_v45 = vpack.c.bf16 %v172_v43, %v171_v42  ;;  %v56_v46 = vld [vmem:[%s629_s0 + $0x8] sm:$0xff]  ;;  %v288_v50 = vld [vmem:[%s631_s2] ss:$0 sm:$0xff]  ;;  %s509_s2 = scalar_lea.vmem %s276_s25, 256 }
  0x32   :  { %407 = vmatpush3.bf16.msra.mxu0 %v404_v8  ;;  %437 = vmatprep.subr.bf16.mxu1 %v436_v23  ;;  %v174_v48 = vld [vmem:[#allocation6 + $0x78] sm:$0xff]  ;;  %v289_v57 = vld [vmem:[%s633_s4] ss:$0 sm:$0xff]  ;;  %p510_p2 = scmp.ne.s32.totalorder %s276_s25, %s509_s2  ;;  %p515_p4 = scmp.lt.s32.totalorder %s509_s2, %s509_s2 }
  0x33   :  { %409 = vmatprep.subr.bf16.mxu0 %v408_v20  ;;  %v456_v49 = vpack.c.bf16 %v174_v48, %v173_v47 }
  0x34   :  { %p516_p5 = por %p515_p4, %p514_p3 }
  0x35   :  { %439 = vmatpush3.bf16.msra.mxu1 %v436_v23 }
  0x36   :  { %411 = vmatpush3.bf16.msra.mxu0 %v408_v20  ;;  %441 = vmatprep.subr.bf16.mxu1 %v440_v29  ;;  %p517_p6 = pnand %p516_p5, %p510_p2 }
  0x37   :  { %413 = vmatprep.subr.bf16.mxu0 %v412_v26 }
  0x39   :  { %443 = vmatpush3.bf16.msra.mxu1 %v440_v29 }
  0x3a   :  { %415 = vmatpush3.bf16.msra.mxu0 %v412_v26  ;;  %445 = vmatprep.subr.bf16.mxu1 %v444_v35 }
  0x3b   :  { %417 = vmatprep.subr.bf16.mxu0 %v416_v32 }
  0x3d   :  { %447 = vmatpush3.bf16.msra.mxu1 %v444_v35 }
  0x3e   :  { %419 = vmatpush3.bf16.msra.mxu0 %v416_v32  ;;  %449 = vmatprep.subr.bf16.mxu1 %v448_v41 }
  0x3f   :  { %421 = vmatprep.subr.bf16.mxu0 %v420_v38 }
  0x41   :  { %451 = vmatpush3.bf16.msra.mxu1 %v448_v41 }
  0x42   :  { %423 = vmatpush3.bf16.msra.mxu0 %v420_v38  ;;  %453 = vmatprep.subr.bf16.mxu1 %v452_v45 }
  0x43   :  { %425 = vmatprep.subr.bf16.mxu0 %v424_v44 }
  0x45   :  { %455 = vmatpush3.bf16.msra.mxu1 %v452_v45 }
  0x46   :  { %427 = vmatpush3.bf16.msra.mxu0 %v424_v44  ;;  %457 = vmatprep.subr.bf16.mxu1 %v456_v49 }
  0x49   :  { %359 = vmatmul.mubr.f32.vlgmr.msra.gmra.mrb[0].mxu0 %v56_v46  ;;  %459 = vmatpush3.bf16.msra.mxu1 %v456_v49 }
 0x11c   :  { %v360_v51 = vpop.f32.mrb[0].mxu0 }
 0x11d   :  { %v152_v52 = vadd.f32 %v360_v51, %v288_v50  ;;  %v146_v53 = vpop.f32.mrb[1].mxu0 }
 0x11e   :  { %v147_v54 = vadd.f32 %v288_v50, %v146_v53 }
 0x11f   :  { %v156_v56 = vmax.f32 %v152_v52, 0.0 }
 0x120   :  { %v155_v55 = vmax.f32 %v147_v54, 0.0 }
 0x122   :  { %393 = vmatprep.mubr.f32.mxu1 %v155_v55 }
 0x123   :  { %394 = vmatmul.mubr.f32.vlgmr.msra.gmra.mrb[0].mxu1 %v156_v56 }
 0x1f6   :  { %v395_v58 = vpop.f32.mrb[0].mxu1 }
 0x1f7   :  { %v267_v59 = vadd.f32 %v395_v58, %v289_v57  ;;  %v241_v60 = vpop.f32.mrb[1].mxu1 }
 0x1f8   :  { %v266_v61 = vadd.f32 %v289_v57, %v241_v60 }
 0x1f9   :  { %269 = vst [vmem:[#allocation8 + $0x8] sm:$0xff] %v267_v59 }
 0x1fa   :  { %268 = vst [vmem:[#allocation8] sm:$0xff] %v266_v61 }
 0x1fb   :  { %520 = shalt.err (!%p517_p6)
}
 0x1fc   :  { %s521_s4 = scalar_lea.hbm %s634_s5, 256 }
 0x1fd   :  { %p522_p7 = scmp.ne.s32.totalorder %s634_s5, %s521_s4  ;;  %p525_p8 = scmp.lt.u32.totalorder %s521_s4, %s634_s5 }
 0x1ff   :  { %p527_p9 = pnand %p525_p8, %p522_p7 }
 0x201   :  { %530 = shalt.err (!%p527_p9)
}
 0x202   :  { %281 = dma.vmem_to_hbm [thread:$0]  %s276_s25, 256, %s634_s5, [#allocation5], %s538_s28, %s538_s28, %s539_s29  }
 0x203   :  { %535 = dma.done.wait [#allocation5], 256  }
 0x204   :  { %536 = vsyncadd [#allocation5], 4294967040 }
 0x205   :  { %285 = vsyncpa [#allocation4], 1 }
 0x206   :  { %286 = vsyncpa [#allocation7], 1 }
 0x207   :  { %287 = vsyncpa [#allocation5], 1 }

</bundles_post_ra>
